<compile_context>
chip_gen: v7x
topology: tpu7x:2x2x1
jax: 0.10.0
libtpu: 0.0.40
codegen_flags: <defaults>
</compile_context>

<pallas_src>
import jax
import jax.numpy as jnp
from jax.experimental import pallas as pl
from jax.experimental.pallas import tpu as pltpu


def _layer_scaler_kernel(g_ref, x_ref, o_ref):
    # Flat path:     g_ref (1, tile_lane),  x_ref/o_ref (B, tile_lane)
    # Fallback path: g_ref (tile_c, 1),     x_ref/o_ref (tile_c, tile_hw)
    # Single broadcasted multiply on the VPU; lane-dense stores in both paths.
    o_ref[...] = g_ref[...] * x_ref[...]


def _round_up(x: int, m: int) -> int:
    return ((x + m - 1) // m) * m


def _vmem_budget():
    """(vmem_limit_bytes, usable_bytes, per-block data cap) for this generation."""
    phys = 64 * 1024 * 1024  # conservative default (v7x-sized) if query fails
    try:
        phys = int(pltpu.get_tpu_info().vmem_capacity_bytes)
    except Exception:
        pass
    # v7x (64 MiB physical) -> 48 MiB limit; v5e/v6e (128 MiB) -> 64 MiB limit.
    vmem_limit = min(64 * 1024 * 1024, (3 * phys) // 4)
    usable = vmem_limit - 4 * 1024 * 1024          # headroom for compiler scratch
    block_cap = min(8 * 1024 * 1024, vmem_limit // 7)  # per-block data target
    return vmem_limit, usable, block_cap


def _pick_lane_tile(dim: int, cap_elems: int) -> int:
    """Largest 128-multiple lane tile <= cap_elems for a dim with dim % 128 == 0.

    Prefers a divisor of `dim` (no partial tail block); falls back to the capped
    non-divisor tile (only the last block is partial/masked)."""
    cap = min(cap_elems, dim)
    cap = max(128, (cap // 128) * 128)
    if dim <= cap:
        return dim
    units = dim // 128
    cap_units = cap // 128
    best = 1
    for u in range(cap_units, 0, -1):
        if units % u == 0:
            best = u
            break
    if best * 2 >= cap_units:      # divisor is close to the cap: take it
        return best * 128
    return cap                     # non-divisor: cdiv grid, masked only on last block


def layer_scaler(x: jax.Array, gamma: jax.Array) -> jax.Array:
    """out = gamma[None, :, None, None] * x  with x in NCHW, gamma of shape (C,)."""
    B, C, H, W = x.shape
    assert gamma.shape == (C,)
    HW = H * W
    CHW = C * HW
    dtype = x.dtype
    itemsize = jnp.dtype(dtype).itemsize
    sub_align = max(8, 32 // itemsize)  # 8 f32, 16 bf16, 32 int8/fp8

    vmem_limit, usable, block_cap = _vmem_budget()
    total_bytes = B * CHW * itemsize

    Bp = _round_up(B, sub_align)  # sublane-padded batch rows in VMEM
    use_flat = (CHW % 128 == 0) and (4 * Bp * 128 * itemsize <= usable)

    if use_flat:
        # ------------------------- flat (B, C*HW) path -------------------------
        # VMEM per lane element: x + out double-buffered (4*Bp rows) plus the
        # gamma row double-buffered (2 * sub_align padded rows).
        per_lane = (4 * Bp + 2 * sub_align) * itemsize
        lane_cap = usable // per_lane
        # Keep the per-block *data* volume around block_cap (long bursts, few steps).
        lane_cap = min(lane_cap, max(128, block_cap // (B * itemsize)))
        # For large tensors, keep >= 2 grid steps so both v7x TCs get work.
        if total_bytes > 4 * 1024 * 1024 and CHW >= 256:
            lane_cap = min(lane_cap, max(128, ((CHW // 2) // 128) * 128))
        tile_lane = _pick_lane_tile(CHW, lane_cap)
        n_lane = pl.cdiv(CHW, tile_lane)

        x2 = x.reshape(B, CHW)
        # Pre-broadcast gamma to one value per (c, hw) position: <= 1/B extra HBM.
        g2 = jnp.repeat(gamma.astype(dtype), HW).reshape(1, CHW)

        cost = pl.CostEstimate(
            flops=B * CHW,
            transcendentals=0,
            bytes_accessed=2 * total_bytes + CHW * itemsize,
        )

        out2 = pl.pallas_call(
            _layer_scaler_kernel,
            out_shape=jax.ShapeDtypeStruct((B, CHW), dtype),
            grid_spec=pltpu.PrefetchScalarGridSpec(
                num_scalar_prefetch=0,
                grid=(n_lane,),
                in_specs=[
                    # gamma row: re-fetched only per lane tile (= CHW bytes total).
                    pl.BlockSpec((1, tile_lane), lambda j: (0, j)),
                    # x slab: full batch folded into the block, lane-dense last dim.
                    pl.BlockSpec((B, tile_lane), lambda j: (0, j)),
                ],
                out_specs=pl.BlockSpec((B, tile_lane), lambda j: (0, j)),
            ),
            compiler_params=pltpu.CompilerParams(
                dimension_semantics=("parallel",),
                vmem_limit_bytes=vmem_limit,
            ),
            cost_estimate=cost,
        )(g2, x2)
        return out2.reshape(B, C, H, W)

    # --------------------- fallback (B, C, HW) path (rare) ----------------------
    x3 = x.reshape(B, C, HW)
    g2 = gamma.astype(dtype).reshape(C, 1)
    HW_pad = _round_up(HW, 128)

    # Lane tile: full HW if even sub_align rows fit the budget, else a VMEM-sized
    # 128-multiple chunk (partial last block masked — boundary only).
    if 4 * sub_align * HW_pad * itemsize <= usable:
        tile_hw = HW
    else:
        tile_hw = max(128, ((usable // (4 * sub_align * itemsize)) // 128) * 128)
    t_hw_pad = _round_up(tile_hw, 128)

    def _c_fits(tc: int) -> bool:
        tcp = _round_up(tc, sub_align)
        need = (4 * tcp * t_hw_pad + 2 * tcp * 128) * itemsize
        return need <= usable

    target_c = min(C, max(sub_align, block_cap // (t_hw_pad * itemsize)))
    if C <= sub_align or (target_c >= C and _c_fits(C)):
        tile_c = C
    else:
        tile_c = max(sub_align, (min(target_c, C - 1) // sub_align) * sub_align)
        while tile_c > sub_align and not _c_fits(tile_c):
            tile_c -= sub_align

    grid = (B, pl.cdiv(C, tile_c), pl.cdiv(HW, tile_hw))

    cost = pl.CostEstimate(
        flops=B * CHW,
        transcendentals=0,
        bytes_accessed=2 * total_bytes + C * itemsize,
    )

    out3 = pl.pallas_call(
        _layer_scaler_kernel,
        out_shape=jax.ShapeDtypeStruct((B, C, HW), dtype),
        grid_spec=pltpu.PrefetchScalarGridSpec(
            num_scalar_prefetch=0,
            grid=grid,
            in_specs=[
                # gamma column: indexed only by the C-tile axis.
                pl.BlockSpec((tile_c, 1), lambda b, i, j: (i, 0)),
                # x tile: batch dim squeezed, spatial last.
                pl.BlockSpec((None, tile_c, tile_hw), lambda b, i, j: (b, i, j)),
            ],
            out_specs=pl.BlockSpec((None, tile_c, tile_hw), lambda b, i, j: (b, i, j)),
        ),
        compiler_params=pltpu.CompilerParams(
            dimension_semantics=("parallel", "parallel", "parallel"),
            vmem_limit_bytes=vmem_limit,
        ),
        cost_estimate=cost,
    )(g2, x3)
    return out3.reshape(B, C, H, W)


if __name__ == "__main__":
    # Module __init__: gamma = s * ones(dim). Deterministic init in-script.
    s = 1e-4
    B, C, H, W = 2, 4, 16, 16
    dim = C

    gamma = s * jnp.ones((dim,), dtype=jnp.float32)

    key = jax.random.PRNGKey(0)
    x = jax.random.normal(key, (B, C, H, W), dtype=jnp.float32)

    out = layer_scaler(x, gamma)
    out = jax.block_until_ready(out)

    # Reference check (plain JAX, mirrors PyTorch broadcast semantics).
    ref = gamma[None, :, None, None] * x
    assert out.shape == ref.shape
    assert jnp.allclose(out, ref, atol=1e-6), "mismatch vs reference"

    print("KERNEL_OK")
</pallas_src>

<mosaic_0001>
module attributes {stable_mosaic.version = 11 : i64} {
  func.func @_layer_scaler_kernel(%arg0: i32, %arg1: memref<1x1024xf32, #tpu.memory_space<vmem>>, %arg2: memref<2x1024xf32, #tpu.memory_space<vmem>>, %arg3: memref<2x1024xf32, #tpu.memory_space<vmem>>) attributes {dimension_semantics = [#tpu.dimension_semantics<parallel>], iteration_bounds = array<i64: 1>, scalar_prefetch = 0 : i64, scratch_operands = 0 : i64, tpu.core_type = #tpu.core_type<tc>, window_params = [{transform_indices = @transform_0, window_bounds = array<i64: 1, 1024>}, {transform_indices = @transform_1, window_bounds = array<i64: 2, 1024>}, {transform_indices = @transform_2, window_bounds = array<i64: 2, 1024>}]} {
    %c0 = arith.constant 0 : index
    %c0_0 = arith.constant 0 : index
    %0 = vector.load %arg1[%c0, %c0_0] : memref<1x1024xf32, #tpu.memory_space<vmem>>, vector<1x1024xf32>
    %c0_1 = arith.constant 0 : index
    %c0_2 = arith.constant 0 : index
    %1 = vector.load %arg2[%c0_1, %c0_2] : memref<2x1024xf32, #tpu.memory_space<vmem>>, vector<2x1024xf32>
    %2 = vector.broadcast %0 : vector<1x1024xf32> to vector<2x1024xf32>
    %3 = arith.mulf %2, %1 : vector<2x1024xf32>
    %c0_3 = arith.constant 0 : index
    %c0_4 = arith.constant 0 : index
    %4 = vector.load %arg3[%c0_3, %c0_4] : memref<2x1024xf32, #tpu.memory_space<vmem>>, vector<2x1024xf32>
    tpu.vector_store %arg3[%c0_3, %c0_4], %3 {strides = array<i32>} : memref<2x1024xf32, #tpu.memory_space<vmem>>, vector<2x1024xf32>,
    return
  }
  func.func @transform_0(%arg0: i32) -> (i32, i32) {
    %c0_i32 = arith.constant 0 : i32
    %c0_i32_0 = arith.constant 0 : i32
    return %c0_i32, %arg0 : i32, i32
  }
  func.func @transform_1(%arg0: i32) -> (i32, i32) {
    %c0_i32 = arith.constant 0 : i32
    %c0_i32_0 = arith.constant 0 : i32
    return %c0_i32, %arg0 : i32, i32
  }
  func.func @transform_2(%arg0: i32) -> (i32, i32) {
    %c0_i32 = arith.constant 0 : i32
    %c0_i32_0 = arith.constant 0 : i32
    return %c0_i32, %arg0 : i32, i32
  }
}

</mosaic_0001>

<bundles_post_ra>
// kernel: tpu_custom_call.1
= control target key start
LH: loop header
LB: loop body
LE: loop exit
PB: predicated region body
PF: predicated region fallthrough
CT: control target
= control target key end

     0   :  { %7 = vsyncpa [#allocation3], 0  ;;  %s327_s0 = inlined_call_operand.hbm [shape: f32[1,1024], index: 0, kind: input, shape index: {}]   ;;  %s328_s1 = inlined_call_operand.hbm [shape: f32[2,1024], index: 1, kind: input, shape index: {}]   ;;  %s329_s2 = inlined_call_operand.hbm [shape: f32[2,1024], index: 2, kind: output, shape index: {}]  }
   0x1   :  { %8 = vsyncpa [#allocation6], 0 }
   0x2   :  { %9 = vsyncpa [#allocation4], 0  ;;  %s272_s9 = smov [#allocation2]   ;;  %s273_s11 = smov [#allocation5]  }
   0x3   :  { %s16_s10 = sshll.u32 %s272_s9, 4  ;;  %s26_s12 = sshll.u32 %s273_s11, 4  ;;  %s17_s10 = int_to_ptr.vmem [resolvable:$true] %s16_s10  ;;  %s27_s12 = int_to_ptr.vmem [resolvable:$true] %s26_s12 }
   0x4   :  { %s200_s15 = scalar_lea.hbm %s327_s0, 128 }
   0x5   :  { %p201_p0 = scmp.ne.s32.totalorder %s327_s0, %s200_s15  ;;  %p204_p1 = scmp.lt.u32.totalorder %s200_s15, %s327_s0 }
   0x7   :  { %p206_p2 = pnand %p204_p1, %p201_p0 }
   0x9   :  { %209 = shalt.err (!%p206_p2)
}
   0xa   :  { %s210_s20 = scalar_lea.vmem %s17_s10, 128  ;;  %p215_p4 = scmp.lt.s32.totalorder %s17_s10, %s17_s10 }
   0xb   :  { %p211_p3 = scmp.ne.s32.totalorder %s17_s10, %s210_s20  ;;  %p216_p5 = scmp.lt.s32.totalorder %s210_s20, %s210_s20 }
   0xd   :  { %p217_p6 = por %p216_p5, %p215_p4 }
   0xf   :  { %p218_p7 = pnand %p217_p6, %p211_p3 }
  0x11   :  { %221 = shalt.err (!%p218_p7)
}
  0x12   :  { %19 = dma.hbm_to_vmem [thread:$0]  %s327_s0, 128, %s17_s10, [#allocation3]  }
  0x13   :  { %s222_s25 = scalar_lea.hbm %s328_s1, 256 }
  0x14   :  { %p223_p8 = scmp.ne.s32.totalorder %s328_s1, %s222_s25  ;;  %p226_p9 = scmp.lt.u32.totalorder %s222_s25, %s328_s1 }
  0x16   :  { %p228_p10 = pnand %p226_p9, %p223_p8 }
  0x18   :  { %231 = shalt.err (!%p228_p10)
}
  0x19   :  { %s232_s30 = scalar_lea.vmem %s27_s12, 256  ;;  %p237_p12 = scmp.lt.s32.totalorder %s27_s12, %s27_s12 }
  0x1a   :  { %p233_p11 = scmp.ne.s32.totalorder %s27_s12, %s232_s30  ;;  %p238_p13 = scmp.lt.s32.totalorder %s232_s30, %s232_s30 }
  0x1c   :  { %p239_p0 = por %p238_p13, %p237_p12 }
  0x1e   :  { %p240_p1 = pnand %p239_p0, %p233_p11 }
  0x20   :  { %243 = shalt.err (!%p240_p1)
}
  0x21   :  { %29 = dma.hbm_to_vmem [thread:$0]  %s328_s1, 256, %s27_s12, [#allocation6]  }
  0x22   :  { %266 = dma.done.wait [#allocation3], 128  }
  0x23   :  { %267 = vsyncadd [#allocation3], 4294967168 }
  0x24   :  { %268 = dma.done.wait [#allocation6], 256  }
  0x25   :  { %269 = vsyncadd [#allocation6], 4294967040  ;;  %v40_v0 = vlaneseq  ;;  %v274_v1 = vmov 1983009808   ;;  %v36_v12 = vld [vmem:[#allocation2] sm:$0xff]  ;;  %v37_v13 = vld [vmem:[#allocation5] sm:$0xff] }
  0x26   :  { %v84_v2 = vunpack.c.l.s4 %v274_v1  ;;  %v38_v15 = vld [vmem:[#allocation5 + $0x8] sm:$0xff]  ;;  %v82_v20 = vcombine.high %v37_v13, %v37_v13  ;;  %s275_s1 = smov [#allocation7]  }
  0x27   :  { %v41_v3 = vshrl.u32 %v40_v0, 7  ;;  %v99_v25 = vcombine.high %v38_v15, %v38_v15  ;;  %s184_s4 = sshll.u32 %s275_s1, 4  ;;  %s185_s4 = int_to_ptr.vmem [resolvable:$true] %s184_s4 }
  0x28   :  { %v85_v4 = vunpack.c.0.s8 %v84_v2  ;;  %s244_s5 = scalar_lea.vmem %s185_s4, 256  ;;  %p249_p3 = scmp.lt.s32.totalorder %s185_s4, %s185_s4 }
  0x29   :  { %v42_v5 = vsub.s32 0, %v41_v3  ;;  %v46_v6 = vsub.s32 1, %v41_v3  ;;  %v50_v7 = vsub.s32 2, %v41_v3  ;;  %v58_v9 = vsub.s32 4, %v41_v3  ;;  %p245_p2 = scmp.ne.s32.totalorder %s185_s4, %s244_s5  ;;  %p250_p4 = scmp.lt.s32.totalorder %s244_s5, %s244_s5 }
  0x2a   :  { %v88_v8 = vsub.s32 %v85_v4, %v41_v3  ;;  %v62_v10 = vsub.s32 5, %v41_v3  ;;  %v66_v11 = vsub.s32 6, %v41_v3  ;;  %v54_v14 = vsub.s32 3, %v41_v3 }
  0x2b   :  { %v43_v16 = vrot.slane %v36_v12, %v42_v5  ;;  %v47_v17 = vrot.slane %v36_v12, %v46_v6  ;;  %v70_v18 = vsub.s32 7, %v41_v3  ;;  %v51_v19 = vrot.slane %v36_v12, %v50_v7  ;;  %p251_p5 = por %p250_p4, %p249_p3 }
  0x2c   :  { %v89_v21 = vrot.slane %v37_v13, %v88_v8  ;;  %v59_v22 = vrot.slane %v36_v12, %v58_v9  ;;  %v63_v23 = vrot.slane %v36_v12, %v62_v10  ;;  %v67_v24 = vrot.slane %v36_v12, %v66_v11 }
  0x2d   :  { %v106_v26 = vrot.slane %v38_v15, %v88_v8  ;;  %v55_v27 = vrot.slane %v36_v12, %v54_v14  ;;  %v96_v28 = vrot.slane %v82_v20, %v88_v8  ;;  %v71_v31 = vrot.slane %v36_v12, %v70_v18  ;;  %p252_p6 = pnand %p251_p5, %p245_p2 }
  0x2e   :  { %v97_v29 = vcombine.high %v89_v21, %v89_v21  ;;  %v124_v30 = vmul.f32 %v89_v21, %v43_v16  ;;  %v113_v32 = vrot.slane %v99_v25, %v88_v8 }
  0x2f   :  { %v114_v33 = vcombine.high %v106_v26, %v106_v26  ;;  %v128_v34 = vmul.f32 %v106_v26, %v59_v22  ;;  %v98_v35 = vcombine.high %v96_v28, %v96_v28  ;;  %v126_v37 = vmul.f32 %v96_v28, %v51_v19 }
  0x30   :  { %v125_v36 = vmul.f32 %v97_v29, %v47_v17  ;;  %v115_v38 = vcombine.high %v113_v32, %v113_v32  ;;  %v130_v40 = vmul.f32 %v113_v32, %v67_v24 }
  0x31   :  { %v129_v39 = vmul.f32 %v114_v33, %v63_v23  ;;  %v127_v41 = vmul.f32 %v98_v35, %v55_v27 }
  0x32   :  { %v140_v42 = vcombine.low %v124_v30, %v125_v36  ;;  %v131_v43 = vmul.f32 %v115_v38, %v71_v31 }
  0x33   :  { %v157_v44 = vcombine.low %v128_v34, %v129_v39  ;;  %v141_v45 = vcombine.low %v126_v37, %v127_v41 }
  0x34   :  { %v148_v46 = vrot.slane %v140_v42, %v88_v8  ;;  %v158_v47 = vcombine.low %v130_v40, %v131_v43 }
  0x35   :  { %v165_v48 = vrot.slane %v157_v44, %v88_v8  ;;  %v155_v49 = vrot.slane %v141_v45, %v88_v8 }
  0x36   :  { %v172_v50 = vrot.slane %v158_v47, %v88_v8 }
  0x37   :  { %v156_v51 = vcombine.low %v148_v46, %v155_v49 }
  0x38   :  { %v173_v52 = vcombine.low %v165_v48, %v172_v50 }
  0x39   :  { %176 = vst [vmem:[#allocation7] sm:$0xff] %v156_v51 }
  0x3a   :  { %177 = vst [vmem:[#allocation7 + $0x8] sm:$0xff] %v173_v52 }
  0x3b   :  { %255 = shalt.err (!%p252_p6)
}
  0x3c   :  { %s256_s8 = scalar_lea.hbm %s329_s2, 256 }
  0x3d   :  { %p257_p7 = scmp.ne.s32.totalorder %s329_s2, %s256_s8  ;;  %p260_p8 = scmp.lt.u32.totalorder %s256_s8, %s329_s2 }
  0x3f   :  { %p262_p9 = pnand %p260_p8, %p257_p7 }
  0x41   :  { %265 = shalt.err (!%p262_p9)
}
  0x42   :  { %187 = dma.vmem_to_hbm [thread:$0]  %s185_s4, 256, %s329_s2, [#allocation4]  }
  0x43   :  { %270 = dma.done.wait [#allocation4], 256  }
  0x44   :  { %271 = vsyncadd [#allocation4], 4294967040 }
  0x45   :  { %191 = vsyncpa [#allocation3], 1 }
  0x46   :  { %192 = vsyncpa [#allocation6], 1 }
  0x47   :  { %193 = vsyncpa [#allocation4], 1 }

</bundles_post_ra>
